<compile_context>
chip_gen: v7x
topology: tpu7x:2x2x1
jax: 0.10.0
libtpu: 0.0.40
codegen_flags: <defaults>
</compile_context>

<pallas_src>
import functools
import math

import numpy as np
import jax
import jax.numpy as jnp
from jax import lax
from jax.experimental import pallas as pl
from jax.experimental.pallas import tpu as pltpu


# ----------------------------------------------------------------------------
# small in-kernel helpers
# ----------------------------------------------------------------------------

def _layernorm(z, gamma, beta, eps=1e-5):
    mu = jnp.mean(z, axis=-1, keepdims=True)
    zc = z - mu
    var = jnp.mean(zc * zc, axis=-1, keepdims=True)
    return zc * lax.rsqrt(var + eps) * gamma + beta


def _rot_half_matrix(C):
    """R such that (x @ R) == rot_half(x): out[2t]=-x[2t+1], out[2t+1]=x[2t]."""
    R = np.zeros((C, C), np.float32)
    t = np.arange(C // 2)
    R[2 * t + 1, 2 * t] = -1.0
    R[2 * t, 2 * t + 1] = 1.0
    return jnp.asarray(R)


# ----------------------------------------------------------------------------
# fused [cross-attention + FFW] layer stack: ONE grid-less pallas_call,
# everything VMEM-resident, batch folded into rows, static layer loop.
# ----------------------------------------------------------------------------

_W_NAMES = ('wq', 'bq', 'wkv', 'bkv', 'wo', 'bo',
            'ln1_g', 'ln1_b', 'w1', 'b1', 'w2', 'b2', 'ln2_g', 'ln2_b')


def _fused_stack_kernel(*args, num_heads, num_layers, nq, nk, use_rotary):
    idx = 0
    x_ref = args[idx]; idx += 1                 # (B*nq, C) query stream
    val_ref = args[idx]; idx += 1               # (B*nk, C) value stream
    if use_rotary:
        qpos_ref = args[idx]; idx += 1          # (B*nq, 2C)  [cos | sin]
        vpos_ref = args[idx]; idx += 1          # (B*nk, 2C)  [cos | sin]
    (wq_ref, bq_ref, wkv_ref, bkv_ref, wo_ref, bo_ref,
     g1_ref, be1_ref, w1_ref, b1_ref, w2_ref, b2_ref,
     g2_ref, be2_ref) = args[idx:idx + 14]
    o_ref = args[idx + 14]

    x = x_ref[...]
    val = val_ref[...]
    M, C = x.shape                              # M = B*nq
    Nv = val.shape[0]                           # Nv = B*nk
    hd = C // num_heads
    scaling = float(hd) ** -0.5

    lane_head = lax.broadcasted_iota(jnp.int32, (1, C), 1) // hd      # (1, C)

    # Static head groups: keep each score block <= 128 rows to bound vreg
    # pressure.  Masks are built once (outside the layer loop) and reused.
    hg = min(num_heads, max(1, 128 // M))
    groups = []
    g0 = 0
    while g0 < num_heads:
        gh = min(hg, num_heads - g0)
        row = lax.broadcasted_iota(jnp.int32, (gh * M, 1), 0)
        gmask = ((g0 + row // M) == lane_head).astype(jnp.float32)    # (gh*M, C)
        srow = lax.broadcasted_iota(jnp.int32, (gh * M, Nv), 0)
        scol = lax.broadcasted_iota(jnp.int32, (gh * M, Nv), 1)
        same_batch = ((srow % M) // nq) == (scol // nk)
        negg = jnp.where(same_batch, 0.0, -1e30).astype(jnp.float32)  # (gh*M, Nv)
        groups.append((gh, gmask, negg))
        g0 += gh

    if use_rotary:
        qpos = qpos_ref[...]
        vpos = vpos_ref[...]
        qcos, qsin = qpos[:, :C], qpos[:, C:]
        kcos, ksin = vpos[:, :C], vpos[:, C:]

    for l in range(num_layers):
        # ---- fused projections (rot_half folded into the weights) ----
        if use_rotary:
            qall = jnp.dot(x, wq_ref[l], preferred_element_type=jnp.float32) + bq_ref[l]
            q = (qall[:, :C] * qcos + qall[:, C:] * qsin) * scaling
            kvall = jnp.dot(val, wkv_ref[l], preferred_element_type=jnp.float32) + bkv_ref[l]
            k = kvall[:, :C] * kcos + kvall[:, C:2 * C] * ksin
            v = kvall[:, 2 * C:]
        else:
            q = (jnp.dot(x, wq_ref[l], preferred_element_type=jnp.float32)
                 + bq_ref[l]) * scaling
            kv = jnp.dot(val, wkv_ref[l], preferred_element_type=jnp.float32) + bkv_ref[l]
            k = kv[:, :C]
            v = kv[:, C:]

        kT = k.T                                                       # (C, Nv)

        # ---- multi-head attention via head-stacked rows (per group) ----
        attn = None
        for gh, gmask, negg in groups:
            qtile = q if gh == 1 else jnp.concatenate([q] * gh, axis=0)
            qblk = qtile * gmask                                       # (gh*M, C)
            s = jnp.dot(qblk, kT, preferred_element_type=jnp.float32) + negg
            s = s - jnp.max(s, axis=-1, keepdims=True)
            p = jnp.exp(s)
            p = p * pl.reciprocal(jnp.sum(p, axis=-1, keepdims=True), approx=True)
            ostk = jnp.dot(p, v, preferred_element_type=jnp.float32)   # (gh*M, C)
            ostk = ostk * gmask
            part = ostk[0:M, :]
            for h in range(1, gh):                                     # aligned slices
                part = part + ostk[h * M:(h + 1) * M, :]
            attn = part if attn is None else attn + part

        # ---- output projection + residual + LayerNorm ----
        attn = jnp.dot(attn, wo_ref[l], preferred_element_type=jnp.float32) + bo_ref[l]
        z = _layernorm(x + attn, g1_ref[l], be1_ref[l])

        # ---- FFW + residual + LayerNorm ----
        h1 = jnp.maximum(
            jnp.dot(z, w1_ref[l], preferred_element_type=jnp.float32) + b1_ref[l], 0.0)
        y = z + jnp.dot(h1, w2_ref[l], preferred_element_type=jnp.float32) + b2_ref[l]
        x = _layernorm(y, g2_ref[l], be2_ref[l])

    o_ref[...] = x


def fused_cross_attn_stack(x, value, params, num_heads, q_pos=None, v_pos=None):
    """Run a stack of [rotary cross-attention + FFW] layers in ONE pallas_call.

    x: (B, Nq, C) query stream, value: (B, Nk, C), params: per-layer-stacked
    weights (leading dim = num_layers), q_pos/v_pos: (B, N, C, 2) or None.
    Returns the last layer's output (B, Nq, C).
    """
    B, Nq, C = x.shape
    Nk = value.shape[1]
    L = params['wq'].shape[0]
    use_rotary = q_pos is not None

    inputs = [x.reshape(B * Nq, C), value.reshape(B * Nk, C)]
    if use_rotary:
        # Pack cos|sin into one lane-dense 2C-wide input per stream.
        qp = jnp.concatenate([q_pos[..., 0], q_pos[..., 1]], axis=-1)
        vp = jnp.concatenate([v_pos[..., 0], v_pos[..., 1]], axis=-1)
        inputs += [qp.reshape(B * Nq, 2 * C), vp.reshape(B * Nk, 2 * C)]
    inputs += [params[name] for name in _W_NAMES]

    kernel = functools.partial(
        _fused_stack_kernel, num_heads=num_heads, num_layers=L,
        nq=Nq, nk=Nk, use_rotary=use_rotary)

    # No grid, no BlockSpecs: every input (activations + all stacked layer
    # weights, < 300 KB total) is whole-array VMEM resident for the call.
    out = pl.pallas_call(
        kernel,
        out_shape=jax.ShapeDtypeStruct((B * Nq, C), jnp.float32),
    )(*inputs)
    return out.reshape(B, Nq, C)


# ----------------------------------------------------------------------------
# standalone small kernels
# ----------------------------------------------------------------------------

def _linear_kernel(x_ref, w_ref, b_ref, o_ref):
    o_ref[...] = (jnp.dot(x_ref[...], w_ref[...],
                          preferred_element_type=jnp.float32) + b_ref[...])


def linear(x, w, b):
    """x: (B, M, K) @ w: (K, N) + b: (N,) — batch folded into rows, one launch."""
    B, M, K = x.shape
    N = w.shape[1]
    out = pl.pallas_call(
        _linear_kernel,
        out_shape=jax.ShapeDtypeStruct((B * M, N), jnp.float32),
    )(x.reshape(B * M, K), w, b.reshape(1, N))
    return out.reshape(B, M, N)


def _rope3d_kernel(xyz_ref, fr_ref, cos_ref, sin_ref):
    pos = xyz_ref[...]                                    # (M, 3)
    phase = (pos[:, 0:1] * fr_ref[0:1, :]
             + pos[:, 1:2] * fr_ref[1:2, :]
             + pos[:, 2:3] * fr_ref[2:3, :])              # (M, F)
    cos_ref[...] = jnp.cos(phase)
    sin_ref[...] = jnp.sin(phase)


def rope3d(xyz, feature_dim):
    """RotaryPositionEncoding3D: xyz (B, N, 3) -> (B, N, F, 2) [cos, sin]."""
    B, N, _ = xyz.shape
    F = feature_dim
    third = F // 3
    half = third // 2
    div_term = np.exp(np.arange(half) * 2.0 * (-math.log(10000.0) / third))
    fr = np.zeros((3, F), np.float32)
    for j in range(F):
        fr[j // third, j] = div_term[(j % third) // 2]
    cos, sin = pl.pallas_call(
        _rope3d_kernel,
        out_shape=(jax.ShapeDtypeStruct((B * N, F), jnp.float32),
                   jax.ShapeDtypeStruct((B * N, F), jnp.float32)),
    )(xyz.astype(jnp.float32).reshape(B * N, 3), jnp.asarray(fr))
    return jnp.stack([cos.reshape(B, N, F), sin.reshape(B, N, F)], axis=-1)


def _fps_kernel(x_ref, idx_ref, *, nsample):
    # Farthest point sampling in feature space, start index 0.
    # TODO(synk): reference (dgl) runs FPS in float64; float32 here may differ on ties.
    x = x_ref[...]                                       # (N, C)
    N = x.shape[0]
    sq = jnp.sum(x * x, axis=-1, keepdims=True)          # (N, 1)
    row_iota = lax.broadcasted_iota(jnp.int32, (N, 1), 0)
    col_iota = lax.broadcasted_iota(jnp.int32, (1, nsample), 1)

    def body(s, carry):
        dist, sel, sel_vec = carry
        sel_vec = jnp.where(col_iota == s, sel, sel_vec)
        xs = x_ref[pl.ds(sel, 1), :]                     # (1, C): single row load
        # ||x - xs||^2 via VPU multiply + lane reduce (no MXU latency in the loop)
        d = sq + jnp.sum(xs * xs) - 2.0 * jnp.sum(x * xs, axis=-1, keepdims=True)
        dist = jnp.minimum(dist, d)
        m = jnp.max(dist)
        nxt = jnp.min(jnp.where(dist == m, row_iota, N)).astype(jnp.int32)
        return dist, nxt, sel_vec

    dist0 = jnp.full((N, 1), jnp.inf, jnp.float32)
    _, _, sel_vec = lax.fori_loop(
        0, nsample, body,
        (dist0, jnp.array(0, jnp.int32), jnp.zeros((1, nsample), jnp.int32)))
    idx_ref[...] = sel_vec


def fps_indices(feats_bnc, nsample):
    B, N, C = feats_bnc.shape
    kernel = functools.partial(_fps_kernel, nsample=nsample)
    out = pl.pallas_call(
        kernel,
        out_shape=jax.ShapeDtypeStruct((B, 1, nsample), jnp.int32),
        grid=(B,),
        in_specs=[pl.BlockSpec((None, N, C), lambda i: (i, 0, 0))],
        out_specs=pl.BlockSpec((None, 1, nsample), lambda i: (i, 0, 0)),
        compiler_params=pltpu.CompilerParams(dimension_semantics=("parallel",)),
    )(feats_bnc)
    return out[:, 0, :]                                  # (B, nsample)


# ----------------------------------------------------------------------------
# Parameter init (deterministic, synthetic)
# ----------------------------------------------------------------------------

def _lin_init(key, fan_in, fan_out):
    w = jax.random.normal(key, (fan_in, fan_out), jnp.float32) * 0.02
    b = jnp.zeros((fan_out,), jnp.float32)
    return w, b


def _stacked_attn_params(key, num_layers, C, hidden, rotary):
    """Per-layer weights stacked on a leading L axis.

    rotary=True packs [Wq | Wq@R] (C,2C) and [Wk | Wk@R | Wv] (C,3C) so the
    rotate-half is a weight-folded matmul column block, not an in-kernel shuffle.
    """
    R = _rot_half_matrix(C)
    per = []
    for k in jax.random.split(key, num_layers):
        ks = jax.random.split(k, 6)
        wq, bq = _lin_init(ks[0], C, C)
        wk, bk = _lin_init(ks[1], C, C)
        wv, bv = _lin_init(ks[2], C, C)
        wo, bo = _lin_init(ks[3], C, C)
        w1, b1 = _lin_init(ks[4], C, hidden)
        w2, b2 = _lin_init(ks[5], hidden, C)
        if rotary:
            wq_c = jnp.concatenate([wq, wq @ R], axis=1)          # (C, 2C)
            bq_c = jnp.concatenate([bq, bq @ R], axis=0)          # (2C,)
            wkv_c = jnp.concatenate([wk, wk @ R, wv], axis=1)     # (C, 3C)
            bkv_c = jnp.concatenate([bk, bk @ R, bv], axis=0)     # (3C,)
        else:
            wq_c, bq_c = wq, bq
            wkv_c = jnp.concatenate([wk, wv], axis=1)             # (C, 2C)
            bkv_c = jnp.concatenate([bk, bv], axis=0)
        per.append(dict(
            wq=wq_c, bq=bq_c, wkv=wkv_c, bkv=bkv_c, wo=wo, bo=bo,
            ln1_g=jnp.ones((C,), jnp.float32), ln1_b=jnp.zeros((C,), jnp.float32),
            w1=w1, b1=b1, w2=w2, b2=b2,
            ln2_g=jnp.ones((C,), jnp.float32), ln2_b=jnp.zeros((C,), jnp.float32)))
    stacked = {}
    for name in _W_NAMES:
        t = jnp.stack([p[name] for p in per], axis=0)
        if t.ndim == 2:                       # biases / LN params -> (L, 1, D)
            t = t[:, None, :]
        stacked[name] = t
    return stacked


# ----------------------------------------------------------------------------
# Encoder (Pallas-backed)
# ----------------------------------------------------------------------------

class EncoderPallas:
    def __init__(self, key, embedding_dim=48, num_attn_heads=8, nhist=3,
                 num_vis_ins_attn_layers=2, fps_subsampling_factor=5,
                 instr_dim=512):
        assert embedding_dim % 6 == 0 and embedding_dim % num_attn_heads == 0
        self.C = embedding_dim
        self.H = num_attn_heads
        self.nhist = nhist
        self.fps_subsampling_factor = fps_subsampling_factor

        ks = jax.random.split(key, 5)
        self.instr_w, self.instr_b = _lin_init(ks[0], instr_dim, embedding_dim)
        self.curr_gripper_embed = (
            jax.random.normal(ks[1], (nhist, embedding_dim), jnp.float32) * 0.02)
        self.goal_gripper_embed = (
            jax.random.normal(ks[2], (1, embedding_dim), jnp.float32) * 0.02)
        # FFWRelativeCrossAttentionModule(embedding_dim, nheads, num_layers=3)
        self.gripper_head = _stacked_attn_params(ks[3], 3, embedding_dim,
                                                 embedding_dim, rotary=True)
        # TODO(synk): ParallelAttention FFN hidden size assumed 4*d_model.
        self.vl_layers = _stacked_attn_params(ks[4], num_vis_ins_attn_layers,
                                              embedding_dim, 4 * embedding_dim,
                                              rotary=False)

    # RotaryPositionEncoding3D
    def relative_pe(self, xyz):
        return rope3d(xyz, self.C)

    # --- public API mirroring the torch module ---
    def encode_instruction(self, instruction):
        B, L, _ = instruction.shape
        instr_feats = linear(instruction, self.instr_w, self.instr_b)   # (B, L, C)
        # cos(0)=1, sin(0)=0 -> constant; no kernel launch / HBM round trip needed.
        instr_dummy_pos = jnp.stack(
            [jnp.ones((B, L, self.C), jnp.float32),
             jnp.zeros((B, L, self.C), jnp.float32)], axis=-1)
        return instr_feats, instr_dummy_pos

    def encode_grippers(self, curr_gripper, goal_gripper, context_feats, context,
                        context_pos=None):
        """Fused curr + goal gripper encoding (shared weights / context K/V)."""
        B = curr_gripper.shape[0]
        nh = self.nhist
        curr_feats = jnp.broadcast_to(self.curr_gripper_embed[None],
                                      (B, nh, self.C))
        goal_feats = jnp.broadcast_to(self.goal_gripper_embed[None],
                                      (B, 1, self.C))
        q_feats = jnp.concatenate([curr_feats, goal_feats], axis=1)     # (B, nh+1, C)
        g_xyz = jnp.concatenate([curr_gripper[..., :3],
                                 goal_gripper[:, None, :3]], axis=1)    # (B, nh+1, 3)
        q_pos = self.relative_pe(g_xyz)                                 # single launch
        if context_pos is None:
            context_pos = self.relative_pe(context)
        out = fused_cross_attn_stack(q_feats, context_feats, self.gripper_head,
                                     self.H, q_pos=q_pos, v_pos=context_pos)
        curr_out = (out[:, :nh], q_pos[:, :nh])
        goal_out = (out[:, nh:], q_pos[:, nh:])
        return curr_out, goal_out

    def _encode_gripper(self, gripper, gripper_embed, context_feats, context,
                        context_pos=None):
        B, npt = gripper.shape[0], gripper.shape[1]
        gripper_feats = jnp.broadcast_to(gripper_embed[None], (B, npt, self.C))
        gripper_pos = self.relative_pe(gripper[..., :3])
        if context_pos is None:
            context_pos = self.relative_pe(context)
        gripper_feats = fused_cross_attn_stack(
            gripper_feats, context_feats, self.gripper_head, self.H,
            q_pos=gripper_pos, v_pos=context_pos)
        return gripper_feats, gripper_pos

    def encode_curr_gripper(self, curr_gripper, context_feats, context,
                            context_pos=None):
        return self._encode_gripper(curr_gripper, self.curr_gripper_embed,
                                    context_feats, context, context_pos)

    def encode_goal_gripper(self, goal_gripper, context_feats, context,
                            context_pos=None):
        return self._encode_gripper(goal_gripper[:, None], self.goal_gripper_embed,
                                    context_feats, context, context_pos)

    def vision_language_attention(self, feats, instr_feats):
        # ParallelAttention with cross_attention1 only and no positional enc.:
        # same fused stack with the rotary path statically disabled.
        return fused_cross_attn_stack(feats, instr_feats, self.vl_layers, self.H)

    def run_fps(self, context_features, context_pos):
        # context_features: (N, B, C) sequence-first, context_pos: (B, N, C, 2)
        N, B, C = context_features.shape
        nsample = max(N // self.fps_subsampling_factor, 1)
        feats_bnc = jnp.transpose(context_features, (1, 0, 2))          # (B, N, C)
        inds = fps_indices(feats_bnc, nsample)                          # (B, nsample)
        sampled_feats = jnp.take_along_axis(feats_bnc, inds[..., None], axis=1)
        sampled_feats = jnp.transpose(sampled_feats, (1, 0, 2))         # (ns, B, C)
        sampled_pos = jnp.take_along_axis(
            context_pos, inds[:, :, None, None], axis=1)                # (B, ns, C, 2)
        return sampled_feats, sampled_pos


# ----------------------------------------------------------------------------
# Demo
# ----------------------------------------------------------------------------

if __name__ == "__main__":
    key = jax.random.PRNGKey(0)
    kp, k1, k2, k3, k4, k5 = jax.random.split(key, 6)

    B = 2            # batch
    F = 48           # embedding_dim (divisible by 6 and by 8 heads)
    H = 8            # num_attn_heads
    NHIST = 3        # nhist
    N_CTX = 16       # number of scene points
    L_INSTR = 8      # instruction length (53 in the real model)
    INSTR_DIM = 512  # CLIP text feature dim

    enc = EncoderPallas(kp, embedding_dim=F, num_attn_heads=H, nhist=NHIST,
                        num_vis_ins_attn_layers=2, fps_subsampling_factor=5,
                        instr_dim=INSTR_DIM)

    instruction = jax.random.normal(k1, (B, L_INSTR, INSTR_DIM), jnp.float32)
    curr_gripper = jax.random.normal(k2, (B, NHIST, 8), jnp.float32)
    goal_gripper = jax.random.normal(k3, (B, 8), jnp.float32)
    context_feats = jax.random.normal(k4, (B, N_CTX, F), jnp.float32)
    context = jax.random.normal(k5, (B, N_CTX, 3), jnp.float32)

    instr_feats, instr_pos = enc.encode_instruction(instruction)

    # Context positional code computed ONCE and reused everywhere.
    context_pos = enc.relative_pe(context)                       # (B, N, F, 2)

    # curr + goal gripper encoders fused into one stack launch.
    (curr_feats, curr_pos), (goal_feats, goal_pos) = enc.encode_grippers(
        curr_gripper, goal_gripper, context_feats, context,
        context_pos=context_pos)

    vl_feats = enc.vision_language_attention(context_feats, instr_feats)

    context_seqfirst = jnp.transpose(context_feats, (1, 0, 2))   # (N, B, F)
    sampled_feats, sampled_pos = enc.run_fps(context_seqfirst, context_pos)

    outputs = (instr_feats, instr_pos, curr_feats, curr_pos,
               goal_feats, goal_pos, vl_feats, sampled_feats, sampled_pos)
    jax.block_until_ready(outputs)

    assert instr_feats.shape == (B, L_INSTR, F)
    assert instr_pos.shape == (B, L_INSTR, F, 2)
    assert curr_feats.shape == (B, NHIST, F)
    assert curr_pos.shape == (B, NHIST, F, 2)
    assert goal_feats.shape == (B, 1, F)
    assert goal_pos.shape == (B, 1, F, 2)
    assert vl_feats.shape == (B, N_CTX, F)
    assert sampled_feats.shape == (max(N_CTX // 5, 1), B, F)
    assert sampled_pos.shape == (B, max(N_CTX // 5, 1), F, 2)

    print("KERNEL_OK")
</pallas_src>

<mosaic_0001>
module attributes {stable_mosaic.version = 11 : i64} {
  func.func @_linear_kernel(%arg0: memref<16x512xf32, #tpu.memory_space<vmem>>, %arg1: memref<512x48xf32, #tpu.memory_space<vmem>>, %arg2: memref<1x48xf32, #tpu.memory_space<vmem>>, %arg3: memref<16x48xf32, #tpu.memory_space<vmem>>) attributes {dimension_semantics = [], scalar_prefetch = 0 : i64, scratch_operands = 0 : i64, tpu.core_type = #tpu.core_type<tc>} {
    %c0 = arith.constant 0 : index
    %c0_0 = arith.constant 0 : index
    %0 = vector.load %arg0[%c0, %c0_0] : memref<16x512xf32, #tpu.memory_space<vmem>>, vector<16x512xf32>
    %c0_1 = arith.constant 0 : index
    %c0_2 = arith.constant 0 : index
    %1 = vector.load %arg1[%c0_1, %c0_2] : memref<512x48xf32, #tpu.memory_space<vmem>>, vector<512x48xf32>
    %cst = arith.constant dense<0.000000e+00> : vector<16x48xf32>
    %2 = tpu.matmul %0, %1, %cst {dimension_numbers = #tpu.dot_dimension_numbers<[1], [0], [0], [1], [0, 0, 1, 1], [], []>} : vector<16x512xf32>, vector<512x48xf32>, vector<16x48xf32> -> vector<16x48xf32>
    %c0_3 = arith.constant 0 : index
    %c0_4 = arith.constant 0 : index
    %3 = vector.load %arg2[%c0_3, %c0_4] : memref<1x48xf32, #tpu.memory_space<vmem>>, vector<1x48xf32>
    %4 = vector.broadcast %3 : vector<1x48xf32> to vector<16x48xf32>
    %5 = arith.addf %2, %4 : vector<16x48xf32>
    %c0_5 = arith.constant 0 : index
    %c0_6 = arith.constant 0 : index
    %6 = vector.load %arg3[%c0_5, %c0_6] : memref<16x48xf32, #tpu.memory_space<vmem>>, vector<16x48xf32>
    tpu.vector_store %arg3[%c0_5, %c0_6], %5 {strides = array<i32>} : memref<16x48xf32, #tpu.memory_space<vmem>>, vector<16x48xf32>,
    return
  }
}

</mosaic_0001>

<bundles_post_ra>
// kernel: tpu_custom_call.1
= control target key start
LH: loop header
LB: loop body
LE: loop exit
PB: predicated region body
PF: predicated region fallthrough
CT: control target
= control target key end

     0   :  { %s685_s0 = inlined_call_operand.vmem [shape: f32[16,512], index: 0, kind: input, shape index: {}]   ;;  %s686_s1 = inlined_call_operand.vmem [shape: f32[512,48], index: 1, kind: input, shape index: {}]   ;;  %s687_s2 = inlined_call_operand.vmem [shape: f32[1,48], index: 2, kind: input, shape index: {}]   ;;  %s688_s3 = inlined_call_operand.hbm [shape: f32[16,48], index: 3, kind: output, shape index: {}]  }
   0x1   :  { %v39_v0 = vld [vmem:[%s686_s1 + $0x80] sm:$0xff]  ;;  %v40_v1 = vld [vmem:[%s686_s1 + $0x88] sm:$0xff]  ;;  %v41_v11 = vld [vmem:[%s686_s1 + $0x90] sm:$0xff] }
   0x2   :  { %v23_v2 = vld [vmem:[%s686_s1] sm:$0xff]  ;;  %v340_v3 = vpack.c.bf16 %v40_v1, %v39_v0  ;;  %v24_v4 = vld [vmem:[%s686_s1 + $0x8] sm:$0xff]  ;;  %v42_v13 = vld [vmem:[%s686_s1 + $0x98] sm:$0xff] }
   0x3   :  { %v71_v5 = vld [vmem:[%s686_s1 + $0x180] sm:$0xff]  ;;  %v72_v6 = vld [vmem:[%s686_s1 + $0x188] sm:$0xff]  ;;  %v342_v7 = vpack.c.bf16 %v24_v4, %v23_v2  ;;  %v25_v14 = vld [vmem:[%s686_s1 + $0x10] sm:$0xff]  ;;  %v344_v16 = vpack.c.bf16 %v42_v13, %v41_v11 }
   0x4   :  { %v372_v8 = vpack.c.bf16 %v72_v6, %v71_v5  ;;  %v55_v9 = vld [vmem:[%s686_s1 + $0x100] sm:$0xff]  ;;  %v56_v10 = vld [vmem:[%s686_s1 + $0x108] sm:$0xff]  ;;  %341 = vmatprep.subr.bf16.mxu0 %v340_v3  ;;  %v26_v15 = vld [vmem:[%s686_s1 + $0x18] sm:$0xff] }
   0x5   :  { %v374_v12 = vpack.c.bf16 %v56_v10, %v55_v9  ;;  %343 = vmatpush3.bf16.msra.mxu0 %v342_v7  ;;  %v346_v17 = vpack.c.bf16 %v26_v15, %v25_v14  ;;  %v73_v18 = vld [vmem:[%s686_s1 + $0x190] sm:$0xff]  ;;  %v74_v19 = vld [vmem:[%s686_s1 + $0x198] sm:$0xff]  ;;  %v43_v23 = vld [vmem:[%s686_s1 + $0xa0] sm:$0xff] }
   0x6   :  { %373 = vmatprep.subr.bf16.mxu1 %v372_v8  ;;  %v57_v20 = vld [vmem:[%s686_s1 + $0x110] sm:$0xff]  ;;  %v376_v21 = vpack.c.bf16 %v74_v19, %v73_v18  ;;  %v58_v22 = vld [vmem:[%s686_s1 + $0x118] sm:$0xff]  ;;  %v44_v24 = vld [vmem:[%s686_s1 + $0xa8] sm:$0xff]  ;;  %345 = vmatprep.subr.bf16.mxu0 %v344_v16 }
   0x7   :  { %375 = vmatpush3.bf16.msra.mxu1 %v374_v12  ;;  %v378_v25 = vpack.c.bf16 %v58_v22, %v57_v20  ;;  %v348_v26 = vpack.c.bf16 %v44_v24, %v43_v23  ;;  %v27_v27 = vld [vmem:[%s686_s1 + $0x20] sm:$0xff]  ;;  %v28_v28 = vld [vmem:[%s686_s1 + $0x28] sm:$0xff]  ;;  %v45_v35 = vld [vmem:[%s686_s1 + $0xb0] sm:$0xff] }
   0x8   :  { %v75_v29 = vld [vmem:[%s686_s1 + $0x1a0] sm:$0xff]  ;;  %377 = vmatprep.subr.bf16.mxu1 %v376_v21  ;;  %v76_v30 = vld [vmem:[%s686_s1 + $0x1a8] sm:$0xff]  ;;  %v350_v33 = vpack.c.bf16 %v28_v28, %v27_v27  ;;  %v46_v36 = vld [vmem:[%s686_s1 + $0xb8] sm:$0xff] }
   0x9   :  { %v59_v31 = vld [vmem:[%s686_s1 + $0x120] sm:$0xff]  ;;  %v60_v32 = vld [vmem:[%s686_s1 + $0x128] sm:$0xff]  ;;  %347 = vmatpush3.bf16.msra.mxu0 %v346_v17  ;;  %v380_v34 = vpack.c.bf16 %v76_v30, %v75_v29  ;;  %v29_v37 = vld [vmem:[%s686_s1 + $0x30] sm:$0xff]  ;;  %v352_v39 = vpack.c.bf16 %v46_v36, %v45_v35 }
   0xa   :  { %349 = vmatprep.subr.bf16.mxu0 %v348_v26  ;;  %v382_v38 = vpack.c.bf16 %v60_v32, %v59_v31  ;;  %v30_v40 = vld [vmem:[%s686_s1 + $0x38] sm:$0xff]  ;;  %v77_v41 = vld [vmem:[%s686_s1 + $0x1b0] sm:$0xff]  ;;  %v47_v46 = vld [vmem:[%s686_s1 + $0xc0] sm:$0xff] }
   0xb   :  { %379 = vmatpush3.bf16.msra.mxu1 %v378_v25  ;;  %v78_v42 = vld [vmem:[%s686_s1 + $0x1b8] sm:$0xff]  ;;  %v61_v44 = vld [vmem:[%s686_s1 + $0x130] sm:$0xff]  ;;  %v48_v47 = vld [vmem:[%s686_s1 + $0xc8] sm:$0xff]  ;;  %v354_v48 = vpack.c.bf16 %v30_v40, %v29_v37 }
   0xc   :  { %381 = vmatprep.subr.bf16.mxu1 %v380_v34  ;;  %v384_v43 = vpack.c.bf16 %v78_v42, %v77_v41  ;;  %v62_v45 = vld [vmem:[%s686_s1 + $0x138] sm:$0xff]  ;;  %v79_v49 = vld [vmem:[%s686_s1 + $0x1c0] sm:$0xff]  ;;  %v80_v50 = vld [vmem:[%s686_s1 + $0x1c8] sm:$0xff]  ;;  %v356_v52 = vpack.c.bf16 %v48_v47, %v47_v46 }
   0xd   :  { %351 = vmatpush3.bf16.msra.mxu0 %v350_v33  ;;  %v386_v51 = vpack.c.bf16 %v62_v45, %v61_v44  ;;  %v31_v53 = vld [vmem:[%s686_s1 + $0x40] sm:$0xff]  ;;  %v32_v54 = vld [vmem:[%s686_s1 + $0x48] sm:$0xff]  ;;  %v388_v56 = vpack.c.bf16 %v80_v50, %v79_v49  ;;  %v49_v58 = vld [vmem:[%s686_s1 + $0xd0] sm:$0xff] }
   0xe   :  { %353 = vmatprep.subr.bf16.mxu0 %v352_v39  ;;  %v63_v55 = vld [vmem:[%s686_s1 + $0x140] sm:$0xff]  ;;  %v64_v57 = vld [vmem:[%s686_s1 + $0x148] sm:$0xff]  ;;  %v50_v59 = vld [vmem:[%s686_s1 + $0xd8] sm:$0xff]  ;;  %v358_v62 = vpack.c.bf16 %v32_v54, %v31_v53 }
   0xf   :  { %383 = vmatpush3.bf16.msra.mxu1 %v382_v38  ;;  %v81_v60 = vld [vmem:[%s686_s1 + $0x1d0] sm:$0xff]  ;;  %v82_v61 = vld [vmem:[%s686_s1 + $0x1d8] sm:$0xff]  ;;  %v390_v63 = vpack.c.bf16 %v64_v57, %v63_v55  ;;  %v360_v0 = vpack.c.bf16 %v50_v59, %v49_v58  ;;  %v51_v6 = vld [vmem:[%s686_s1 + $0xe0] sm:$0xff] }
  0x10   :  { %385 = vmatprep.subr.bf16.mxu1 %v384_v43  ;;  %v33_v1 = vld [vmem:[%s686_s1 + $0x50] sm:$0xff]  ;;  %v34_v2 = vld [vmem:[%s686_s1 + $0x58] sm:$0xff]  ;;  %v392_v4 = vpack.c.bf16 %v82_v61, %v81_v60  ;;  %v52_v7 = vld [vmem:[%s686_s1 + $0xe8] sm:$0xff] }
  0x11   :  { %355 = vmatpush3.bf16.msra.mxu0 %v354_v48  ;;  %v65_v3 = vld [vmem:[%s686_s1 + $0x150] sm:$0xff]  ;;  %v66_v5 = vld [vmem:[%s686_s1 + $0x158] sm:$0xff]  ;;  %v83_v8 = vld [vmem:[%s686_s1 + $0x1e0] sm:$0xff]  ;;  %v362_v10 = vpack.c.bf16 %v34_v2, %v33_v1  ;;  %v364_v14 = vpack.c.bf16 %v52_v7, %v51_v6 }
  0x12   :  { %357 = vmatprep.subr.bf16.mxu0 %v356_v52  ;;  %v84_v9 = vld [vmem:[%s686_s1 + $0x1e8] sm:$0xff]  ;;  %v35_v11 = vld [vmem:[%s686_s1 + $0x60] sm:$0xff]  ;;  %v394_v13 = vpack.c.bf16 %v66_v5, %v65_v3  ;;  %v53_v19 = vld [vmem:[%s686_s1 + $0xf0] sm:$0xff] }
  0x13   :  { %387 = vmatpush3.bf16.msra.mxu1 %v386_v51  ;;  %v36_v12 = vld [vmem:[%s686_s1 + $0x68] sm:$0xff]  ;;  %v67_v15 = vld [vmem:[%s686_s1 + $0x160] sm:$0xff]  ;;  %v396_v18 = vpack.c.bf16 %v84_v9, %v83_v8  ;;  %v54_v20 = vld [vmem:[%s686_s1 + $0xf8] sm:$0xff] }
  0x14   :  { %389 = vmatprep.subr.bf16.mxu1 %v388_v56  ;;  %v68_v16 = vld [vmem:[%s686_s1 + $0x168] sm:$0xff]  ;;  %v18_v21 = vld [vmem:[%s685_s0 + $0x18] sm:$0xff]  ;;  %v85_v22 = vld [vmem:[%s686_s1 + $0x1f0] sm:$0xff]  ;;  %v366_v24 = vpack.c.bf16 %v36_v12, %v35_v11 }
  0x15   :  { %359 = vmatpush3.bf16.msra.mxu0 %v358_v62  ;;  %v16_v17 = vld [vmem:[%s685_s0 + $0x8] sm:$0xff]  ;;  %v86_v23 = vld [vmem:[%s686_s1 + $0x1f8] sm:$0xff]  ;;  %233 = vmatprep.mubr.f32.mxu1 %v18_v21 }
  0x16   :  { %361 = vmatprep.subr.bf16.mxu0 %v360_v0  ;;  %158 = vmatprep.mubr.f32.mxu0 %v16_v17 }
  0x17   :  { %391 = vmatpush3.bf16.msra.mxu1 %v390_v63 }
  0x18   :  { %393 = vmatprep.subr.bf16.mxu1 %v392_v4 }
  0x19   :  { %363 = vmatpush3.bf16.msra.mxu0 %v362_v10 }
  0x1a   :  { %8 = vsyncpa [#allocation3], 0  ;;  %365 = vmatprep.subr.bf16.mxu0 %v364_v14  ;;  %v398_v25 = vpack.c.bf16 %v68_v16, %v67_v15  ;;  %v368_v26 = vpack.c.bf16 %v54_v20, %v53_v19  ;;  %v37_v27 = vld [vmem:[%s686_s1 + $0x70] sm:$0xff]  ;;  %v38_v28 = vld [vmem:[%s686_s1 + $0x78] sm:$0xff]  ;;  %v400_v29 = vpack.c.bf16 %v86_v23, %v85_v22  ;;  %vm244_vm0 = vcmask 392192  }
  0x1b   :  { %395 = vmatpush3.bf16.msra.mxu1 %v394_v13  ;;  %v69_v30 = vld [vmem:[%s686_s1 + $0x170] sm:$0xff]  ;;  %v70_v31 = vld [vmem:[%s686_s1 + $0x178] sm:$0xff]  ;;  %v370_v32 = vpack.c.bf16 %v38_v28, %v37_v27  ;;  %v15_v34 = vld [vmem:[%s685_s0] sm:$0xff] }
  0x1c   :  { %397 = vmatprep.subr.bf16.mxu1 %v396_v18  ;;  %v402_v33 = vpack.c.bf16 %v70_v31, %v69_v30  ;;  %v17_v35 = vld [vmem:[%s685_s0 + $0x10] sm:$0xff]  ;;  %v20_v36 = vld [vmem:[%s685_s0 + $0x28] sm:$0xff]  ;;  %v22_v37 = vld [vmem:[%s685_s0 + $0x38] sm:$0xff] }
  0x1d   :  { %367 = vmatpush3.bf16.msra.mxu0 %v366_v24  ;;  %v19_v38 = vld [vmem:[%s685_s0 + $0x20] sm:$0xff]  ;;  %v21_v39 = vld [vmem:[%s685_s0 + $0x30] sm:$0xff]  ;;  %s431_s0 = smov [#allocation2]  }
  0x1e   :  { %369 = vmatprep.subr.bf16.mxu0 %v368_v26  ;;  %v263_v41 = vld [vmem:[%s687_s2] ss:$0 sm:$0xff]  ;;  %s252_s22 = sshll.u32 %s431_s0, 4  ;;  %s253_s22 = int_to_ptr.vmem [resolvable:$true] %s252_s22 }
  0x1f   :  { %399 = vmatpush3.bf16.msra.mxu1 %v398_v25  ;;  %s407_s2 = scalar_lea.vmem %s253_s22, 256  ;;  %p412_p1 = scmp.lt.s32.totalorder %s253_s22, %s253_s22 }
  0x20   :  { %401 = vmatprep.subr.bf16.mxu1 %v400_v29  ;;  %p408_p0 = scmp.ne.s32.totalorder %s253_s22, %s407_s2  ;;  %p413_p2 = scmp.lt.s32.totalorder %s407_s2, %s407_s2 }
  0x21   :  { %371 = vmatpush3.bf16.msra.mxu0 %v370_v32 }
  0x22   :  { %p414_p3 = por %p413_p2, %p412_p1 }
  0x23   :  { %403 = vmatpush3.bf16.msra.mxu1 %v402_v33 }
  0x24   :  { %159 = vmatmul.mubr.f32.vlgmr.msra.gmra.mrb[0].mxu0 %v15_v34  ;;  %p415_p4 = pnand %p414_p3, %p408_p0 }
  0x25   :  { %163 = vmatprep.mubr.f32.mxu0 %v20_v36 }
  0x26   :  { %234 = vmatmul.mubr.f32.vlgmr.msra.gmra.mrb[0].mxu1 %v17_v35 }
  0x27   :  { %238 = vmatprep.mubr.f32.mxu1 %v22_v37 }
  0x28   :  { %164 = vmatmul.mubr.f32.gmra.mrb[2].mxu0 %v19_v38 }
  0x2a   :  { %239 = vmatmul.mubr.f32.gmra.mrb[2].mxu1 %v21_v39 }
  0xf7   :  { %v296_v40 = vpop.f32.mrb[0].mxu0 }
  0xf8   :  { %v297_v42 = vpop.f32.mrb[1].mxu0 }
  0xf9   :  { %v334_v43 = vpop.f32.mrb[0].mxu1  ;;  %v298_v44 = vadd.f32 %v297_v42, %v296_v40 }
  0xfa   :  { %v335_v45 = vpop.f32.mrb[1].mxu1 }
  0xfb   :  { %v336_v46 = vadd.f32 %v335_v45, %v334_v43  ;;  %v161_v47 = vadd.f32 %v298_v44, %v263_v41  ;;  %v299_v48 = vpop.f32.mrb[2].mxu0 }
  0xfc   :  { %v300_v49 = vpop.f32.mrb[3].mxu0 }
  0xfd   :  { %v337_v50 = vpop.f32.mrb[2].mxu1  ;;  %v236_v51 = vadd.f32 %v336_v46, %v161_v47  ;;  %v301_v52 = vadd.f32 %v300_v49, %v299_v48 }
  0xfe   :  { %v338_v53 = vpop.f32.mrb[3].mxu1 }
  0xff   :  { %v339_v54 = vadd.f32 %v338_v53, %v337_v50  ;;  %245 = vst.msk [vmem:[#allocation2] sm:$0xff] %vm244_vm0, %v236_v51  ;;  %v166_v55 = vadd.f32 %v301_v52, %v263_v41 }
 0x101   :  { %v241_v56 = vadd.f32 %v339_v54, %v166_v55 }
 0x103   :  { %246 = vst.msk [vmem:[#allocation2 + $0x8] sm:$0xff] %vm244_vm0, %v241_v56 }
 0x104   :  { %418 = shalt.err (!%p415_p4)
}
 0x105   :  { %s419_s25 = scalar_lea.hbm %s688_s3, 256 }
 0x106   :  { %p420_p5 = scmp.ne.s32.totalorder %s688_s3, %s419_s25  ;;  %p423_p6 = scmp.lt.u32.totalorder %s419_s25, %s688_s3 }
 0x108   :  { %p425_p7 = pnand %p423_p6, %p420_p5 }
 0x10a   :  { %428 = shalt.err (!%p425_p7)
}
 0x10b   :  { %s432_s30 = smov 128   ;;  %s433_s4 = smov 8  }
 0x10c   :  { %258 = dma.vmem_to_hbm [thread:$0]  %s253_s22, 256, %s688_s3, [#allocation3], %s432_s30, %s432_s30, %s433_s4  }
 0x10d   :  { %429 = dma.done.wait [#allocation3], 256  }
 0x10e   :  { %430 = vsyncadd [#allocation3], 4294967040 }
 0x10f   :  { %262 = vsyncpa [#allocation3], 1 }

</bundles_post_ra>
